<compile_context>
chip_gen: v7x
topology: tpu7x:2x2x1
jax: 0.10.0
libtpu: 0.0.40
codegen_flags: <defaults>
</compile_context>

<pallas_src>
import functools

import jax
import jax.numpy as jnp
from jax.experimental import pallas as pl
from jax.experimental.pallas import tpu as pltpu

EPS = 1e-5      # nn.LayerNorm default eps
SLOPE = 0.1     # nn.LeakyReLU(0.1)


def _layer_norm(x, gamma, beta):
    # PyTorch LayerNorm: biased variance, eps inside rsqrt.
    mean = jnp.mean(x, axis=-1, keepdims=True)
    var = jnp.mean((x - mean) ** 2, axis=-1, keepdims=True)
    return (x - mean) * jax.lax.rsqrt(var + EPS) * gamma + beta


def _leaky(x):
    return jnp.where(x > 0, x, SLOPE * x)


# ---------------------------------------------------------------------------
# Kernel 1: hoisted Q/K/V projection — one lane-dense matmul for the whole
# sequence, executed once (review item 1: no per-grid-step recompute).
# ---------------------------------------------------------------------------
def qkv_proj_kernel(x_ref, w_ref, o_ref):
    o_ref[...] = jnp.dot(x_ref[...], w_ref[...],
                         preferred_element_type=jnp.float32)


# ---------------------------------------------------------------------------
# Kernel 2: attention core + AttentionLayer tail + AttentionBlock tail.
# One grid step = all batches x one tile of query positions.
# ---------------------------------------------------------------------------
def attention_block_kernel(q_ref, kbd_ref, vbd_ref, wmats_ref, vecs_ref,
                           o_ref, *, scale):
    B, tq, F = q_ref.shape

    # ---- head-batched attention via block-diagonal K/V (no per-head loop) ---
    # scores[b, q, h*S+k] = <Q_h[b,q,:], K_h[b,k,:]> / sqrt(Dh); cross-head
    # columns are exact zeros in K_bd so they never mix.
    s = jnp.einsum('bqf,bfj->bqj', q_ref[...], kbd_ref[...],
                   preferred_element_type=jnp.float32) * scale     # (B, tq, H*S)

    # F.softmax(..., dim=0): normalize over the BATCH axis, independently per
    # (query, head*key) column — so no per-head bookkeeping is needed.
    m = jnp.max(s, axis=0, keepdims=True)
    e = jnp.exp(s - m)
    # EUP reciprocal instead of a VALU divide.  approx=False keeps the 1e-4
    # reference check; approx=True is the production setting.
    inv = pl.reciprocal(jnp.sum(e, axis=0, keepdims=True), approx=False)
    att = e * inv

    # attention @ V for all heads at once; V_bd routes each head's keys to that
    # head's feature block, so the result is already head-packed (B, tq, F).
    heads = jnp.einsum('bqj,bjf->bqf', att, vbd_ref[...],
                       preferred_element_type=jnp.float32)
    heads2 = heads.reshape(B * tq, F)                 # leading-dim merge only

    # ---- grouped bias/LN vectors and stacked square weights ----
    vecs = vecs_ref[...]                              # (9, F)
    blin, ga, ba = vecs[0:1], vecs[1:2], vecs[2:3]
    g1, b1 = vecs[3:4], vecs[4:5]
    bff1, bff2 = vecs[5:6], vecs[6:7]
    g2, b2 = vecs[7:8], vecs[8:9]
    wlin, wff1, wff2 = wmats_ref[0], wmats_ref[1], wmats_ref[2]

    # ---- AttentionLayer tail: linear -> layer_norm -> leaky_relu ----
    lin = jnp.dot(heads2, wlin, preferred_element_type=jnp.float32) + blin
    att_out = _leaky(_layer_norm(lin, ga, ba))

    # ---- AttentionBlock: LN, feed-forward, residual, LN (dropout p=0) ----
    xb = _layer_norm(att_out, g1, b1)
    hff = _leaky(jnp.dot(xb, wff1, preferred_element_type=jnp.float32) + bff1)
    ff = jnp.dot(hff, wff2, preferred_element_type=jnp.float32) + bff2
    out = _layer_norm(ff + xb, g2, b2)

    o_ref[...] = out.reshape(B, tq, F).astype(o_ref.dtype)


# ---------------------------------------------------------------------------
# Wrapper: packs weights lane-dense, hoists the Q/K/V projection, builds the
# head-block-diagonal K/V layout, and sets up the (possibly collapsed) grid.
# ---------------------------------------------------------------------------
def attention_block(x, params, *, tq=None):
    B, S, Fin = x.shape
    H, _, Dh = params['wq'].shape
    F = H * Dh
    HS = H * S

    # ---- query-tile choice: collapse the grid whenever everything fits VMEM
    # (review item: per-grid-step overhead dominates at small sizes).
    if tq is None:
        budget = 24 * 1024 * 1024
        resident = 4 * (2 * B * F * HS + 3 * F * F + 9 * F)   # K_bd, V_bd, weights

        def fits(t):
            return resident + 4 * 4 * B * t * F <= budget     # dbl-buffered q + out tiles

        if fits(S):
            tq = S
        else:
            tq = 8
            for t in (1024, 512, 256, 128, 64, 32, 16, 8):
                if S % t == 0 and fits(t):
                    tq = t
                    break
    assert S % tq == 0 and (tq == S or tq % 8 == 0), \
        "query tile must divide S (8-aligned)"

    # ---- weight packing (once; in a real model, at init) ----
    def pack(w):                                   # (H, Fin, Dh) -> (Fin, H*Dh)
        return jnp.transpose(w, (1, 0, 2)).reshape(Fin, F)

    w_qkv = jnp.concatenate(
        [pack(params['wq']), pack(params['wk']), pack(params['wv'])], axis=1)   # (Fin, 3F)
    wmats = jnp.stack([params['wlin'], params['wff1'], params['wff2']])         # (3, F, F)
    vecs = jnp.concatenate(
        [params['blin'], params['ga'], params['ba'], params['g1'], params['b1'],
         params['bff1'], params['bff2'], params['g2'], params['b2']], axis=0)   # (9, F)

    # ---- hoisted projection: one lane-dense matmul over the whole sequence ---
    qkv = pl.pallas_call(
        qkv_proj_kernel,
        out_shape=jax.ShapeDtypeStruct((B * S, 3 * F), jnp.float32),
    )(x.reshape(B * S, Fin), w_qkv)

    q = qkv[:, :F].reshape(B, S, F)                 # head-major features
    k = qkv[:, F:2 * F].reshape(B, S, H, Dh)
    v = qkv[:, 2 * F:].reshape(B, S, H, Dh)

    # ---- head-block-diagonal K/V packing (pure layout, wrapper-side XLA) ----
    eye = jnp.eye(H, dtype=jnp.float32)
    k_bd = jnp.einsum('bshd,hg->bhdgs', k, eye).reshape(B, F, HS)   # (B, F, H*S)
    v_bd = jnp.einsum('bshd,gh->bgshd', v, eye).reshape(B, HS, F)   # (B, H*S, F)

    kernel = functools.partial(attention_block_kernel,
                               scale=1.0 / float(Dh) ** 0.5)

    cost = pl.CostEstimate(
        flops=int(2 * B * S * F * (2 * HS + 3 * F)),
        transcendentals=int(B * S * HS),
        bytes_accessed=int(4 * (2 * B * S * F + 2 * B * F * HS + 3 * F * F + 9 * F)),
    )

    out = pl.pallas_call(
        kernel,
        out_shape=jax.ShapeDtypeStruct((B, S, F), jnp.float32),
        grid=(S // tq,),
        in_specs=[
            pl.BlockSpec((B, tq, F), lambda i: (0, i, 0)),    # Q tile (pipelined)
            pl.BlockSpec((B, F, HS), lambda i: (0, 0, 0)),    # block-diag K, resident
            pl.BlockSpec((B, HS, F), lambda i: (0, 0, 0)),    # block-diag V, resident
            pl.BlockSpec((3, F, F), lambda i: (0, 0, 0)),     # wlin, wff1, wff2
            pl.BlockSpec((9, F), lambda i: (0, 0)),           # biases + LN params
        ],
        out_specs=pl.BlockSpec((B, tq, F), lambda i: (0, i, 0)),
        compiler_params=pltpu.CompilerParams(
            dimension_semantics=("parallel",),   # independent query tiles -> 2 TCs on v7x
            vmem_limit_bytes=32 * 1024 * 1024,   # fits v7x's 64 MiB physical VMEM
        ),
        cost_estimate=cost,
    )(q, k_bd, v_bd, wmats, vecs)
    return out


# ---------------------------------------------------------------------------
# Pure-JAX reference mirroring the PyTorch forward pass.
# ---------------------------------------------------------------------------
def reference(x, p):
    H, Fin, Dh = p['wq'].shape
    outs = []
    for h in range(H):
        q = x @ p['wq'][h]
        k = x @ p['wk'][h]
        v = x @ p['wv'][h]
        sc = jnp.einsum('bqd,bkd->bqk', q, k) / jnp.sqrt(jnp.float32(Dh))
        att = jax.nn.softmax(sc, axis=0)           # F.softmax(dim=0) over batch
        outs.append(jnp.einsum('bqk,bkd->bqd', att, v))
    cat = jnp.concatenate(outs, axis=-1)
    lin = cat @ p['wlin'] + p['blin']
    a = _leaky(_layer_norm(lin, p['ga'], p['ba']))
    xb = _layer_norm(a, p['g1'], p['b1'])
    hff = _leaky(xb @ p['wff1'] + p['bff1'])
    ff = hff @ p['wff2'] + p['bff2']
    return _layer_norm(ff + xb, p['g2'], p['b2'])


def make_params(key, n_heads, in_features, out_features):
    dh = out_features // n_heads
    ks = jax.random.split(key, 8)

    def lin_w(k, fan_in, shape):
        return jax.random.normal(k, shape, jnp.float32) / jnp.sqrt(jnp.float32(fan_in))

    return dict(
        wq=lin_w(ks[0], in_features, (n_heads, in_features, dh)),
        wk=lin_w(ks[1], in_features, (n_heads, in_features, dh)),
        wv=lin_w(ks[2], in_features, (n_heads, in_features, dh)),
        wlin=lin_w(ks[3], out_features, (out_features, out_features)),
        blin=jax.random.normal(ks[4], (1, out_features), jnp.float32) * 0.01,
        ga=jnp.ones((1, out_features), jnp.float32),
        ba=jnp.zeros((1, out_features), jnp.float32),
        g1=jnp.ones((1, out_features), jnp.float32),
        b1=jnp.zeros((1, out_features), jnp.float32),
        wff1=lin_w(ks[5], out_features, (out_features, out_features)),
        bff1=jax.random.normal(ks[6], (1, out_features), jnp.float32) * 0.01,
        wff2=lin_w(ks[7], out_features, (out_features, out_features)),
        bff2=jnp.zeros((1, out_features), jnp.float32),
        g2=jnp.ones((1, out_features), jnp.float32),
        b2=jnp.zeros((1, out_features), jnp.float32),
    )


if __name__ == "__main__":
    B, S = 2, 16
    n_heads, in_features, out_features = 4, 32, 32

    key = jax.random.PRNGKey(0)
    kx, kp = jax.random.split(key)
    x = jax.random.normal(kx, (B, S, in_features), jnp.float32)
    params = make_params(kp, n_heads, in_features, out_features)

    ref = reference(x, params)

    # Default: grid collapsed to a single step (whole problem in VMEM).
    out_collapsed = jax.block_until_ready(attention_block(x, params))
    # Explicit query tiling: exercises the multi-step pipelined grid path.
    out_tiled = jax.block_until_ready(attention_block(x, params, tq=8))

    assert out_collapsed.shape == (B, S, out_features)
    assert jnp.allclose(out_collapsed, ref, rtol=1e-4, atol=1e-4), \
        "kernel/reference mismatch (collapsed grid)"
    assert jnp.allclose(out_tiled, ref, rtol=1e-4, atol=1e-4), \
        "kernel/reference mismatch (tiled grid)"

    print("KERNEL_OK")
</pallas_src>

<mosaic_0001>
module attributes {stable_mosaic.version = 11 : i64} {
  func.func @qkv_proj_kernel(%arg0: memref<32x32xf32, #tpu.memory_space<vmem>>, %arg1: memref<32x96xf32, #tpu.memory_space<vmem>>, %arg2: memref<32x96xf32, #tpu.memory_space<vmem>>) attributes {dimension_semantics = [], scalar_prefetch = 0 : i64, scratch_operands = 0 : i64, tpu.core_type = #tpu.core_type<tc>} {
    %c0 = arith.constant 0 : index
    %c0_0 = arith.constant 0 : index
    %0 = vector.load %arg0[%c0, %c0_0] : memref<32x32xf32, #tpu.memory_space<vmem>>, vector<32x32xf32>
    %c0_1 = arith.constant 0 : index
    %c0_2 = arith.constant 0 : index
    %1 = vector.load %arg1[%c0_1, %c0_2] : memref<32x96xf32, #tpu.memory_space<vmem>>, vector<32x96xf32>
    %cst = arith.constant dense<0.000000e+00> : vector<32x96xf32>
    %2 = tpu.matmul %0, %1, %cst {dimension_numbers = #tpu.dot_dimension_numbers<[1], [0], [0], [1], [0, 0, 1, 1], [], []>} : vector<32x32xf32>, vector<32x96xf32>, vector<32x96xf32> -> vector<32x96xf32>
    %c0_3 = arith.constant 0 : index
    %c0_4 = arith.constant 0 : index
    %3 = vector.load %arg2[%c0_3, %c0_4] : memref<32x96xf32, #tpu.memory_space<vmem>>, vector<32x96xf32>
    tpu.vector_store %arg2[%c0_3, %c0_4], %2 {strides = array<i32>} : memref<32x96xf32, #tpu.memory_space<vmem>>, vector<32x96xf32>,
    return
  }
}

</mosaic_0001>

<bundles_post_ra>
// kernel: tpu_custom_call.1
= control target key start
LH: loop header
LB: loop body
LE: loop exit
PB: predicated region body
PF: predicated region fallthrough
CT: control target
= control target key end

     0   :  { %7 = vsyncpa [#allocation3], 0  ;;  %s353_s0 = inlined_call_operand.hbm [shape: f32[32,32], index: 0, kind: input, shape index: {}]   ;;  %s354_s1 = inlined_call_operand.hbm [shape: f32[32,96], index: 1, kind: input, shape index: {}]   ;;  %s355_s2 = inlined_call_operand.hbm [shape: f32[32,96], index: 2, kind: output, shape index: {}]  }
   0x1   :  { %8 = vsyncpa [#allocation6], 0 }
   0x2   :  { %9 = vsyncpa [#allocation4], 0  ;;  %s284_s9 = smov [#allocation2]   ;;  %s212_s13 = scalar_lea.hbm %s353_s0, 512 }
   0x3   :  { %s15_s10 = sshll.u32 %s284_s9, 4  ;;  %p213_p0 = scmp.ne.s32.totalorder %s353_s0, %s212_s13  ;;  %s16_s10 = int_to_ptr.vmem [resolvable:$true] %s15_s10 }
   0x4   :  { %p216_p1 = scmp.lt.u32.totalorder %s212_s13, %s353_s0 }
   0x6   :  { %p218_p2 = pnand %p216_p1, %p213_p0 }
   0x8   :  { %221 = shalt.err (!%p218_p2)
}
   0x9   :  { %s222_s18 = scalar_lea.vmem %s16_s10, 512  ;;  %p227_p4 = scmp.lt.s32.totalorder %s16_s10, %s16_s10 }
   0xa   :  { %p223_p3 = scmp.ne.s32.totalorder %s16_s10, %s222_s18  ;;  %p228_p5 = scmp.lt.s32.totalorder %s222_s18, %s222_s18 }
   0xc   :  { %p229_p6 = por %p228_p5, %p227_p4 }
   0xe   :  { %p230_p7 = pnand %p229_p6, %p223_p3 }
  0x10   :  { %233 = shalt.err (!%p230_p7)
}
  0x11   :  { %s285_s19 = smov 128   ;;  %s286_s20 = smov 8  }
  0x12   :  { %21 = dma.hbm_to_vmem [thread:$0]  %s353_s0, 512, %s16_s10, [#allocation3], %s285_s19, %s285_s19, %s286_s20  }
  0x13   :  { %s287_s23 = smov [#allocation5]   ;;  %s234_s27 = scalar_lea.hbm %s354_s1, 512 }
  0x14   :  { %s27_s24 = sshll.u32 %s287_s23, 4  ;;  %p235_p8 = scmp.ne.s32.totalorder %s354_s1, %s234_s27  ;;  %s28_s24 = int_to_ptr.vmem [resolvable:$true] %s27_s24 }
  0x15   :  { %p238_p9 = scmp.lt.u32.totalorder %s234_s27, %s354_s1 }
  0x17   :  { %p240_p10 = pnand %p238_p9, %p235_p8 }
  0x19   :  { %243 = shalt.err (!%p240_p10)
}
  0x1a   :  { %s244_s4 = scalar_lea.vmem %s28_s24, 512  ;;  %p249_p12 = scmp.lt.s32.totalorder %s28_s24, %s28_s24 }
  0x1b   :  { %p245_p11 = scmp.ne.s32.totalorder %s28_s24, %s244_s4  ;;  %p250_p13 = scmp.lt.s32.totalorder %s244_s4, %s244_s4 }
  0x1d   :  { %p251_p0 = por %p250_p13, %p249_p12 }
  0x1f   :  { %p252_p1 = pnand %p251_p0, %p245_p11 }
  0x21   :  { %255 = shalt.err (!%p252_p1)
}
  0x22   :  { %33 = dma.hbm_to_vmem [thread:$0]  %s354_s1, 512, %s28_s24, [#allocation6], %s285_s19, %s285_s19, %s286_s20  }
  0x23   :  { %278 = dma.done.wait [#allocation3], 512  }
  0x24   :  { %279 = vsyncadd [#allocation3], 4294966784 }
  0x25   :  { %280 = dma.done.wait [#allocation6], 512  }
  0x26   :  { %281 = vsyncadd [#allocation6], 4294966784  ;;  %vm48_vm0 = vcmask 261120   ;;  %v44_v0 = vld [vmem:[#allocation5] sm:$0xff]  ;;  %v45_v1 = vld [vmem:[#allocation5 + $0x8] sm:$0xff]  ;;  %s288_s1 = smov [#allocation7]  }
  0x27   :  { %v46_v2 = vld [vmem:[#allocation5 + $0x10] sm:$0xff]  ;;  %v195_v3 = vpack.c.bf16 %v45_v1, %v44_v0  ;;  %v47_v4 = vld [vmem:[#allocation5 + $0x18] sm:$0xff]  ;;  %v40_v5 = vld [vmem:[#allocation2] sm:$0xff]  ;;  %s156_s6 = sshll.u32 %s288_s1, 4  ;;  %vm146_vm1 = vcmask 785408   ;;  %s157_s6 = int_to_ptr.vmem [resolvable:$true] %s156_s6 }
  0x28   :  { %v42_v6 = vld [vmem:[#allocation2 + $0x10] sm:$0xff]  ;;  %v199_v7 = vpack.c.bf16 %v47_v4, %v46_v2  ;;  %189 = vmatprep.mubr.msk.f32.mxu0 %vm48_vm0, %v40_v5  ;;  %v41_v8 = vld [vmem:[#allocation2 + $0x8] sm:$0xff]  ;;  %v43_v9 = vld [vmem:[#allocation2 + $0x18] sm:$0xff]  ;;  %s256_s7 = scalar_lea.vmem %s157_s6, 512  ;;  %p261_p3 = scmp.lt.s32.totalorder %s157_s6, %s157_s6 }
  0x29   :  { %192 = vmatprep.mubr.msk.f32.mxu1 %vm48_vm0, %v42_v6  ;;  %196 = vmatprep.subr.bf16.mxu0 %v195_v3  ;;  %p257_p2 = scmp.ne.s32.totalorder %s157_s6, %s256_s7  ;;  %p262_p4 = scmp.lt.s32.totalorder %s256_s7, %s256_s7 }
  0x2a   :  { %203 = vmatprep.subr.bf16.mxu1 %v195_v3  ;;  %198 = vmatpush3.bf16.msra.mxu0 %v195_v3 }
  0x2b   :  { %205 = vmatpush3.bf16.msra.mxu1 %v195_v3  ;;  %200 = vmatprep.subr.bf16.mxu0 %v199_v7  ;;  %p263_p5 = por %p262_p4, %p261_p3 }
  0x2c   :  { %204 = vmatprep.subr.bf16.mxu1 %v199_v7 }
  0x2d   :  { %p264_p6 = pnand %p263_p5, %p257_p2 }
  0x2e   :  { %202 = vmatpush3.bf16.msra.mxu0 %v199_v7 }
  0x2f   :  { %206 = vmatpush3.bf16.msra.mxu1 %v199_v7 }
  0x31   :  { %190 = vmatmul.mubr.msk.f32.vlgmr.msra.gmra.mrb[0].mxu0 %vm48_vm0, %v41_v8 }
  0x32   :  { %193 = vmatmul.mubr.msk.f32.vlgmr.msra.gmra.mrb[0].mxu1 %vm48_vm0, %v43_v9 }
 0x104   :  { %v191_v10 = vpop.f32.mrb[0].mxu0 }
 0x105   :  { %v194_v11 = vpop.f32.mrb[0].mxu1  ;;  %148 = vst.msk [vmem:[#allocation7 + $0x8] sm:$0xff] %vm146_vm1, %v191_v10  ;;  %v127_v12 = vpop.f32.mrb[1].mxu0 }
 0x106   :  { %150 = vst.msk [vmem:[#allocation7 + $0x18] sm:$0xff] %vm146_vm1, %v194_v11  ;;  %v137_v13 = vpop.f32.mrb[1].mxu1  ;;  %147 = vst.msk [vmem:[#allocation7] sm:$0xff] %vm146_vm1, %v127_v12 }
 0x107   :  { %149 = vst.msk [vmem:[#allocation7 + $0x10] sm:$0xff] %vm146_vm1, %v137_v13 }
 0x108   :  { %267 = shalt.err (!%p264_p6)
}
 0x109   :  { %s268_s10 = scalar_lea.hbm %s355_s2, 512 }
 0x10a   :  { %p269_p7 = scmp.ne.s32.totalorder %s355_s2, %s268_s10  ;;  %p272_p8 = scmp.lt.u32.totalorder %s268_s10, %s355_s2 }
 0x10c   :  { %p274_p9 = pnand %p272_p8, %p269_p7 }
 0x10e   :  { %277 = shalt.err (!%p274_p9)
}
 0x10f   :  { %162 = dma.vmem_to_hbm [thread:$0]  %s157_s6, 512, %s355_s2, [#allocation4], %s285_s19, %s285_s19, %s286_s20  }
 0x110   :  { %282 = dma.done.wait [#allocation4], 512  }
 0x111   :  { %283 = vsyncadd [#allocation4], 4294966784 }
 0x112   :  { %166 = vsyncpa [#allocation3], 1 }
 0x113   :  { %167 = vsyncpa [#allocation6], 1 }
 0x114   :  { %168 = vsyncpa [#allocation4], 1 }

</bundles_post_ra>
